<compile_context>
chip_gen: v5e
topology: v5e:2x2
jax: 0.10.0
libtpu: 0.0.40
codegen_flags: <defaults>
</compile_context>

<pallas_src>
import itertools
import numpy as np
import jax
import jax.numpy as jnp
from jax import lax
from jax.experimental import pallas as pl
from jax.experimental.pallas import tpu as pltpu

_MiB = 1024 * 1024


# ---------------------------------------------------------------------------
# Small helpers
# ---------------------------------------------------------------------------
def _round_up(v, m):
    return ((v + m - 1) // m) * m


def _pick_tile(n, cap):
    """Largest divisor of n that is <= cap."""
    t = max(1, min(n, int(cap)))
    while n % t:
        t -= 1
    return t


def _vmem_budget_bytes():
    """Per-generation VMEM budget (v5e/v6e: 128 MiB physical -> 96 MiB budget,
    v7x: 64 MiB -> 48 MiB).  Used both for tile selection and vmem_limit_bytes."""
    cap = 128 * _MiB
    try:
        cap = int(getattr(pltpu.get_tpu_info(), "vmem_capacity_bytes", cap))
    except Exception:
        pass
    return int(max(32 * _MiB, min(cap * 3 // 4, 96 * _MiB)))


# ---------------------------------------------------------------------------
# Deterministic "parameters" (no learned weights; analytic Gaussian / spectral filters).
# ---------------------------------------------------------------------------
def _gaussian_deriv_band(size, sigma, truncate=1.5):
    """band[i, j] = g'(j - i) with zero ('constant') padding.
    (band @ x) differentiates along a leading axis; (x @ band.T) along a trailing axis."""
    radius = int(truncate * sigma + 0.5)
    offs = np.arange(-radius, radius + 1, dtype=np.float64)
    phi = np.exp(-0.5 * (offs / sigma) ** 2)
    phi /= phi.sum()
    w = (offs / sigma ** 2) * phi                      # derivative-of-Gaussian weights
    i = np.arange(size)[:, None]
    j = np.arange(size)[None, :]
    off = j - i
    band = np.where(np.abs(off) <= radius, w[np.clip(off + radius, 0, 2 * radius)], 0.0)
    return jnp.asarray(band, dtype=jnp.float32)


def _dpsr_spectral_factor(res, sig):
    """fac[d, x, y, kz] = G_sigma(|omega|) * 2*pi*omega_d / (Lap + 1e-6); DC term folded to 0."""
    freqs = [np.fft.fftfreq(r, d=1.0 / r) for r in res[:-1]]
    freqs.append(np.fft.rfftfreq(res[-1], d=1.0 / res[-1]))
    omega = np.stack(np.meshgrid(*freqs, indexing="ij"), axis=-1)   # (X, Y, Kz, 3)
    dis = np.sqrt((omega ** 2).sum(-1))
    gauss = np.exp(-0.5 * ((sig * 2.0 * dis / res[0]) ** 2))        # spec_gaussian_filter
    omega2pi = omega * (2.0 * np.pi)
    lap = -(omega2pi ** 2).sum(-1)
    fac = gauss[..., None] * omega2pi / (lap[..., None] + 1e-6)
    fac[0, 0, 0, :] = 0.0              # DC component zeroed host-side (no in-kernel iota/where)
    return jnp.asarray(np.transpose(fac, (3, 0, 1, 2)), dtype=jnp.float32)   # (3, X, Y, Kz)


# ---------------------------------------------------------------------------
# Kernel 1: fused softmax(classes) + exclude_background + DiVRoC trilinear splat.
#   grid[b, c, x, y, z] = sum_p probs[b, c, p] * wx[p, x] * wy[p, y] * wz[p, z]
# Tiled over (batch, X-tiles, P-chunks); P is the reduction axis (accumulated into the
# resident output block); the per-class loop is merged into one (Cfg*Tx, Tp) bf16 matmul.
# ---------------------------------------------------------------------------
def _make_splat_kernel(C, first_fg, Cfg, X, Y, Z, Tx, Tp):
    YZ = Y * Z

    def kernel(logits_ref, coords_ref, out_ref):
        @pl.when(pl.program_id(2) == 0)
        def _():
            out_ref[...] = jnp.zeros_like(out_ref)

        # fused softmax over the class axis (padded points carry zero splat weight below)
        logits = logits_ref[0]                                       # (C, Tp)
        e = jnp.exp(logits - jnp.max(logits, axis=0, keepdims=True))
        probs = e / jnp.sum(e, axis=0, keepdims=True)
        probs_fg = probs[first_fg:, :]                               # (Cfg, Tp)

        def hat(axis_idx, R, rows, base):
            c = coords_ref[0, axis_idx:axis_idx + 1, :]              # (1, Tp) in [-1, 1]
            vox = (c + 1.0) * 0.5 * (R - 1)                          # align_corners=True
            idx = (base + lax.broadcasted_iota(jnp.int32, (rows, Tp), 0)).astype(jnp.float32)
            return jnp.maximum(1.0 - jnp.abs(vox - idx), 0.0)        # (rows, Tp)

        x_base = pl.program_id(1) * Tx
        wx = hat(0, X, Tx, x_base)                                   # (Tx, Tp) f32
        wy = hat(1, Y, Y, 0).astype(jnp.bfloat16)                    # (Y, Tp)
        wz = hat(2, Z, Z, 0).astype(jnp.bfloat16)                    # (Z, Tp)
        # Outer product keeps the point axis on lanes; (Y,Z,Tp) -> (Y*Z,Tp) only merges
        # leading dims so it is a free reshape (no relayout).
        wyz = (wy[:, None, :] * wz[None, :, :]).reshape(YZ, Tp)      # (Y*Z, Tp) bf16
        a = (probs_fg[:, None, :] * wx[None, :, :]).reshape(Cfg * Tx, Tp).astype(jnp.bfloat16)
        # A @ B^T contracting the point (lane) axis of both operands -- same pattern as
        # flash attention's q @ k^T: the MXU ingests the stationary operand transposed
        # natively, so no XLU transpose of the ~Tp*Y*Z bf16 weight slab is materialized.
        res = lax.dot_general(a, wyz, dimension_numbers=(((1,), (1,)), ((), ())),
                              preferred_element_type=jnp.float32)    # (Cfg*Tx, Y*Z) f32
        out_ref[...] += res.reshape(1, Cfg, Tx, YZ)

    return kernel


def _splat_tiles(X, YZ, Cfg, B, P, budget):
    """Maximize MXU M = Cfg*Tx first (>=128, ideally >=256), then Tp, within the VMEM
    budget: 2x double-buffered output block + matmul result + bf16 wyz + margin."""
    tp_cap = max(128, min(512, _round_up(P, 128)))
    for cap in (128, 64, 32, 16, 8):
        tx = _pick_tile(X, cap)
        if B == 1 and tx == X and X > 8:
            continue                 # keep >=2 parallel X-tiles for megacore when batch==1
        for tp in (512, 256, 128):
            tp = min(tp, tp_cap)
            need = (3 * Cfg * tx * YZ * 4        # out (x2 buffers) + matmul result
                    + tp * YZ * 2                # bf16 wyz slab
                    + Cfg * tx * tp * 6          # a / probs / wx transients
                    + 8 * _MiB)                  # headroom for compiler scratch
            if need <= budget:
                return tx, tp
    return _pick_tile(X, 8), min(128, tp_cap)


def splat_probs_to_grid(seg_logits, coords, res, first_fg, budget):
    """Fused softmax + background drop + trilinear point->voxel splat.  Returns (B, Cfg, X, Y, Z)."""
    B, C, P = seg_logits.shape
    X, Y, Z = res
    Cfg = C - first_fg
    YZ = Y * Z
    Tx, Tp = _splat_tiles(X, YZ, Cfg, B, P, budget)
    seg_logits = seg_logits.astype(jnp.float32)
    coords = coords.astype(jnp.float32)
    P_pad = _round_up(P, Tp)
    if P_pad != P:
        pad = P_pad - P
        seg_logits = jnp.pad(seg_logits, ((0, 0), (0, 0), (0, pad)))
        # pad coords far outside [-1, 1] -> zero hat weight -> padded points contribute nothing
        coords = jnp.pad(coords, ((0, 0), (0, 0), (0, pad)), constant_values=-10.0)
    out = pl.pallas_call(
        _make_splat_kernel(C, first_fg, Cfg, X, Y, Z, Tx, Tp),
        out_shape=jax.ShapeDtypeStruct((B, Cfg, X, YZ), jnp.float32),
        grid=(B, X // Tx, P_pad // Tp),
        in_specs=[
            pl.BlockSpec((1, C, Tp), lambda b, xt, p: (b, 0, p)),
            pl.BlockSpec((1, 3, Tp), lambda b, xt, p: (b, 0, p)),
        ],
        out_specs=pl.BlockSpec((1, Cfg, Tx, YZ), lambda b, xt, p: (b, 0, xt, 0)),
        compiler_params=pltpu.CompilerParams(
            dimension_semantics=("parallel", "parallel", "arbitrary"),
            vmem_limit_bytes=budget),
    )(seg_logits, coords)
    return out.reshape(B, Cfg, X, Y, Z)


# ---------------------------------------------------------------------------
# Kernel 2a: grad_x + grad_z in one pass, tiled over Y, on the native layout
#            (grad_x = band_x @ (X, Ty*Z); grad_z = (X*Ty, Z) @ band_z^T).
# Kernel 2b: grad_y, tiled over X (per-x (Y, Y) @ (Y, Z) matmuls).
# Outputs are returned as three separate (N, X, Y, Z) arrays and consumed per-channel
# downstream; there is no (N, 3, X, Y, Z) stack / extra HBM pass any more.
# ---------------------------------------------------------------------------
def _grad_xz_kernel(x_ref, dx_ref, dzT_ref, gx_ref, gz_ref):
    blk = x_ref[0]                                                   # (X, Ty, Z) f32
    Xb, Ty, Zb = blk.shape
    # d/dz: contract the lane axis; merging (X, Ty) -> X*Ty keeps lanes intact (free).
    gz = jnp.dot(blk.reshape(Xb * Ty, Zb), dzT_ref[...],
                 preferred_element_type=jnp.float32)
    gz_ref[0] = gz.reshape(Xb, Ty, Zb)
    # d/dx: contract the leading axis as (X, X) @ (X, Ty*Z).  Note: the (X,Ty,Z)->(X,Ty*Z)
    # merge is a sublane->lane relayout; if bundle profiling shows this kernel XLU-bound,
    # switch to a per-y-slice strided-matmul loop instead (HBM usually dominates here).
    gx = jnp.dot(dx_ref[...], blk.reshape(Xb, Ty * Zb),
                 preferred_element_type=jnp.float32)
    gx_ref[0] = gx.reshape(Xb, Ty, Zb)


def _make_grad_y_kernel(TxB):
    def kernel(x_ref, dy_ref, gy_ref):
        dy = dy_ref[...]
        for t in range(TxB):                                         # small, unrolled
            gy_ref[0, t] = jnp.dot(dy, x_ref[0, t], preferred_element_type=jnp.float32)
    return kernel


def gaussian_gradients(seg_grid, band_x, band_y, band_z_t, budget):
    """Gaussian-derivative gradients of seg_grid (N, X, Y, Z) with no HBM transposes."""
    N, X, Y, Z = seg_grid.shape
    # VMEM-budget-derived tiles: ~12 live block-sized buffers in the xz pass,
    # ~6 in the y pass (inputs/outputs double-buffered + relayout transients).
    Ty = _pick_tile(Y, max(8, budget // (12 * X * Z * 4)))
    gx, gz = pl.pallas_call(
        _grad_xz_kernel,
        out_shape=(jax.ShapeDtypeStruct((N, X, Y, Z), jnp.float32),
                   jax.ShapeDtypeStruct((N, X, Y, Z), jnp.float32)),
        grid=(N, Y // Ty),
        in_specs=[
            pl.BlockSpec((1, X, Ty, Z), lambda n, yt: (n, 0, yt, 0)),
            pl.BlockSpec((X, X), lambda n, yt: (0, 0)),
            pl.BlockSpec((Z, Z), lambda n, yt: (0, 0)),
        ],
        out_specs=(pl.BlockSpec((1, X, Ty, Z), lambda n, yt: (n, 0, yt, 0)),
                   pl.BlockSpec((1, X, Ty, Z), lambda n, yt: (n, 0, yt, 0))),
        compiler_params=pltpu.CompilerParams(
            dimension_semantics=("parallel", "parallel"),
            vmem_limit_bytes=budget),
    )(seg_grid, band_x, band_z_t)

    TxB = _pick_tile(X, max(8, min(32, budget // (6 * Y * Z * 4))))
    gy = pl.pallas_call(
        _make_grad_y_kernel(TxB),
        out_shape=jax.ShapeDtypeStruct((N, X, Y, Z), jnp.float32),
        grid=(N, X // TxB),
        in_specs=[
            pl.BlockSpec((1, TxB, Y, Z), lambda n, xt: (n, xt, 0, 0)),
            pl.BlockSpec((Y, Y), lambda n, xt: (0, 0)),
        ],
        out_specs=pl.BlockSpec((1, TxB, Y, Z), lambda n, xt: (n, xt, 0, 0)),
        compiler_params=pltpu.CompilerParams(
            dimension_semantics=("parallel", "parallel"),
            vmem_limit_bytes=budget),
    )(seg_grid, band_y)
    return gx, gy, gz


# ---------------------------------------------------------------------------
# Kernel 3: DPSR spectral solve: Phi_hat = -i * sum_d Nhat_d * fac_d (DC already 0 in fac).
# Lane-dense layout (last dim Y*Kz); grid is (X-tiles, batch*class) with batch*class
# innermost so the constant spectral-factor block stays resident (no per-batch re-DMA).
# Channels arrive as three separate re/im pairs (no (BC,3,...) stack upstream).
# ---------------------------------------------------------------------------
def _spectral_kernel(fac_ref, xre_ref, xim_ref, yre_ref, yim_ref, zre_ref, zim_ref,
                     pre_ref, pim_ref):
    f0, f1, f2 = fac_ref[0], fac_ref[1], fac_ref[2]                  # (Tx, Y*Kz) each
    pre_ref[0] = xim_ref[0] * f0 + yim_ref[0] * f1 + zim_ref[0] * f2     # Re(-i * sum N*fac)
    pim_ref[0] = -(xre_ref[0] * f0 + yre_ref[0] * f1 + zre_ref[0] * f2)  # Im(-i * sum N*fac)


def spectral_poisson(nx, ny, nz, fac_flat, budget):
    """nx/ny/nz are (re, im) pairs of shape (BC, X, Y*Kz)."""
    BC, X, YK = nx[0].shape
    # ~22 block-row-sized live buffers (6 inputs + 2 outputs double-buffered + fac x2).
    Tx = _pick_tile(X, max(8, min(64, int(budget * 0.8) // (88 * YK))))
    chan_spec = pl.BlockSpec((1, Tx, YK), lambda xt, n: (n, xt, 0))
    return pl.pallas_call(
        _spectral_kernel,
        out_shape=(jax.ShapeDtypeStruct((BC, X, YK), jnp.float32),
                   jax.ShapeDtypeStruct((BC, X, YK), jnp.float32)),
        grid=(X // Tx, BC),
        in_specs=[pl.BlockSpec((3, Tx, YK), lambda xt, n: (0, xt, 0))] + [chan_spec] * 6,
        out_specs=(chan_spec, chan_spec),
        compiler_params=pltpu.CompilerParams(
            dimension_semantics=("parallel", "arbitrary"),
            vmem_limit_bytes=budget),
    )(fac_flat, nx[0], nx[1], ny[0], ny[1], nz[0], nz[1])


# ---------------------------------------------------------------------------
# Glue: trilinear interpolation of the PSR field at point locations via 8-corner gather.
# ---------------------------------------------------------------------------
def _trilinear_gather(phi, pts01):
    BC, X, Y, Z = phi.shape
    hi = jnp.asarray([X - 1, Y - 1, Z - 1], jnp.int32)
    g = pts01 * (jnp.asarray([X, Y, Z], jnp.float32) - 1.0)          # (BC, P, 3)
    g0 = jnp.floor(g)
    frac = g - g0
    i0 = jnp.clip(g0.astype(jnp.int32), 0, hi)
    i1 = jnp.minimum(i0 + 1, hi)
    phi_flat = phi.reshape(BC, X * Y * Z)
    out = jnp.zeros(pts01.shape[:2], jnp.float32)
    for sx, sy, sz in itertools.product((0, 1), repeat=3):
        ix = i1[..., 0] if sx else i0[..., 0]
        iy = i1[..., 1] if sy else i0[..., 1]
        iz = i1[..., 2] if sz else i0[..., 2]
        w = ((frac[..., 0] if sx else 1.0 - frac[..., 0]) *
             (frac[..., 1] if sy else 1.0 - frac[..., 1]) *
             (frac[..., 2] if sz else 1.0 - frac[..., 2]))
        lin = (ix * Y + iy) * Z + iz
        out = out + w * jnp.take_along_axis(phi_flat, lin, axis=1)
    return out                                                       # (BC, P)


# ---------------------------------------------------------------------------
# SoftMesh (Pallas)
# ---------------------------------------------------------------------------
class SoftMeshPallas:
    def __init__(self, smoothing_sigma=10, dpsr_res=(128, 128, 128), dpsr_sigma=10,
                 dpsr_scale=True, dpsr_shift=True, exclude_background=True):
        self.smoothing_sigma = smoothing_sigma
        self.res = tuple(dpsr_res)
        self.dpsr_sigma = dpsr_sigma
        self.dpsr_scale = dpsr_scale
        self.dpsr_shift = dpsr_shift
        self.exclude_background = exclude_background
        self.vmem_budget = _vmem_budget_bytes()
        X, Y, Z = self.res
        # deterministic analytic "parameters"
        self.band_x = _gaussian_deriv_band(X, smoothing_sigma)
        self.band_y = _gaussian_deriv_band(Y, smoothing_sigma)
        self.band_z_t = jnp.transpose(_gaussian_deriv_band(Z, smoothing_sigma))
        Kz = Z // 2 + 1
        self.spec_fac = _dpsr_spectral_factor(self.res, dpsr_sigma).reshape(3, X, Y * Kz)

    def _spectral_psr(self, pts01, gx, gy, gz):
        X, Y, Z = self.res
        Kz = Z // 2 + 1
        BC = gx.shape[0]

        # TODO(synk): 3-D rFFT / irFFT has no Pallas TPU equivalent; done with jnp.fft.
        def rfft_ri(u):
            uh = jnp.fft.rfftn(u, axes=(1, 2, 3))                    # (BC, X, Y, Kz) complex
            return (jnp.real(uh).astype(jnp.float32).reshape(BC, X, Y * Kz),
                    jnp.imag(uh).astype(jnp.float32).reshape(BC, X, Y * Kz))

        phre, phim = spectral_poisson(rfft_ri(gx), rfft_ri(gy), rfft_ri(gz),
                                      self.spec_fac, self.vmem_budget)
        phi_hat = (phre + 1j * phim).reshape(BC, X, Y, Kz)
        phi = jnp.fft.irfftn(phi_hat, s=self.res, axes=(1, 2, 3)).astype(jnp.float32)
        if self.dpsr_shift or self.dpsr_scale:
            fv = _trilinear_gather(phi, pts01)                       # (BC, P)
            if self.dpsr_shift:
                phi = phi - jnp.mean(fv, axis=-1)[:, None, None, None]
            if self.dpsr_scale:
                fv0 = phi[:, 0, 0, 0]
                phi = -phi / jnp.abs(fv0)[:, None, None, None] * 0.5
        return phi

    def __call__(self, seg_logits, coords):
        B, C, P = seg_logits.shape
        X, Y, Z = self.res
        first_fg = 1 if self.exclude_background else 0
        Cfg = C - first_fg

        # Pallas: fused class softmax + background drop + DiVRoC trilinear splat.
        seg_grid = splat_probs_to_grid(seg_logits, coords, self.res, first_fg,
                                       self.vmem_budget)             # (B, Cfg, X, Y, Z)
        seg_grid = seg_grid.reshape(B * Cfg, X, Y, Z)

        # Pallas: Gaussian-derivative smoothing along x / y / z on the native layout;
        # channels stay separate (consumed per-channel by the FFT + spectral kernel).
        gx, gy, gz = gaussian_gradients(seg_grid, self.band_x, self.band_y,
                                        self.band_z_t, self.vmem_budget)

        # Points repeated per foreground class, mapped to [0, 1] for interpolation.
        pts01 = (jnp.transpose(coords.astype(jnp.float32), (0, 2, 1)) + 1.0) * 0.5   # (B, P, 3)
        pts01 = jnp.repeat(pts01, Cfg, axis=0)                       # (B*Cfg, P, 3)

        psr_grid = self._spectral_psr(pts01, gx, gy, gz)             # (B*Cfg, X, Y, Z)

        # TODO(synk): DifferentiableMarchingCubes + pytorch3d Meshes have no Pallas/JAX
        # equivalent; the PSR implicit grid (marching-cubes input) is returned instead.
        return psr_grid


if __name__ == "__main__":
    key = jax.random.PRNGKey(0)
    k1, k2 = jax.random.split(key)
    B, C, P = 2, 4, 64
    seg_logits = jax.random.normal(k1, (B, C, P), dtype=jnp.float32)
    coords = jax.random.uniform(k2, (B, 3, P), dtype=jnp.float32, minval=-0.9, maxval=0.9)

    model = SoftMeshPallas(smoothing_sigma=2, dpsr_res=(16, 16, 16), dpsr_sigma=2)
    psr_grid = model(seg_logits, coords)
    jax.block_until_ready(psr_grid)
    assert psr_grid.shape == (B * (C - 1), 16, 16, 16)
    print("KERNEL_OK")
</pallas_src>

<mosaic_0001>
module attributes {stable_mosaic.version = 11 : i64} {
  func.func @kernel(%arg0: i32, %arg1: i32, %arg2: i32, %arg3: memref<1x4x128xf32, #tpu.memory_space<vmem>>, %arg4: memref<1x3x128xf32, #tpu.memory_space<vmem>>, %arg5: memref<1x3x16x256xf32, #tpu.memory_space<vmem>>) attributes {dimension_semantics = [#tpu.dimension_semantics<parallel>, #tpu.dimension_semantics<parallel>, #tpu.dimension_semantics<arbitrary>], iteration_bounds = array<i64: 2, 1, 1>, scalar_prefetch = 0 : i64, scratch_operands = 0 : i64, tpu.core_type = #tpu.core_type<tc>, window_params = [{transform_indices = @transform_0, window_bounds = array<i64: 1, 4, 128>}, {transform_indices = @transform_1, window_bounds = array<i64: 1, 3, 128>}, {transform_indices = @transform_2, window_bounds = array<i64: 1, 3, 16, 256>}]} {
    %c0_i32 = arith.constant 0 : i32
    %0 = arith.cmpi eq, %arg2, %c0_i32 : i32
    %1 = arith.extui %0 : i1 to i32
    %c0_i32_0 = arith.constant 0 : i32
    %2 = arith.cmpi ne, %1, %c0_i32_0 : i32
    scf.if %2 {
      %cst_37 = arith.constant 0.000000e+00 : f32
      %93 = vector.broadcast %cst_37 : f32 to vector<1x3x16x256xf32>
      %c0_38 = arith.constant 0 : index
      %c0_39 = arith.constant 0 : index
      %c0_40 = arith.constant 0 : index
      %c0_41 = arith.constant 0 : index
      %94 = vector.load %arg5[%c0_38, %c0_39, %c0_40, %c0_41] : memref<1x3x16x256xf32, #tpu.memory_space<vmem>>, vector<1x3x16x256xf32>
      tpu.vector_store %arg5[%c0_38, %c0_39, %c0_40, %c0_41], %93 {strides = array<i32>} : memref<1x3x16x256xf32, #tpu.memory_space<vmem>>, vector<1x3x16x256xf32>,
    } else {
    }
    %c0 = arith.constant 0 : index
    %c0_1 = arith.constant 0 : index
    %c0_2 = arith.constant 0 : index
    %3 = vector.load %arg3[%c0, %c0_1, %c0_2] : memref<1x4x128xf32, #tpu.memory_space<vmem>>, vector<1x4x128xf32>
    %4 = vector.shape_cast %3 : vector<1x4x128xf32> to vector<4x128xf32>
    %cst = arith.constant dense<0xFF800000> : vector<128xf32>
    %5 = vector.multi_reduction <maximumf>, %4, %cst [0] : vector<4x128xf32> to vector<128xf32>
    %6 = vector.shape_cast %5 : vector<128xf32> to vector<1x128xf32>
    %7 = vector.broadcast %6 : vector<1x128xf32> to vector<4x128xf32>
    %8 = arith.subf %4, %7 : vector<4x128xf32>
    %9 = math.exp %8 : vector<4x128xf32>
    %cst_3 = arith.constant dense<0.000000e+00> : vector<128xf32>
    %10 = vector.multi_reduction <add>, %9, %cst_3 [0] : vector<4x128xf32> to vector<128xf32>
    %11 = vector.shape_cast %10 : vector<128xf32> to vector<1x128xf32>
    %12 = vector.broadcast %11 : vector<1x128xf32> to vector<4x128xf32>
    %13 = arith.divf %9, %12 : vector<4x128xf32>
    %14 = vector.extract_strided_slice %13 {offsets = [1, 0], sizes = [3, 128], strides = [1, 1]} : vector<4x128xf32> to vector<3x128xf32>
    %c16_i32 = arith.constant 16 : i32
    %15 = arith.muli %arg1, %c16_i32 : i32
    %c0_4 = arith.constant 0 : index
    %c0_5 = arith.constant 0 : index
    %c0_6 = arith.constant 0 : index
    %16 = vector.load %arg4[%c0_4, %c0_5, %c0_6] : memref<1x3x128xf32, #tpu.memory_space<vmem>>, vector<1x1x128xf32>
    %17 = vector.shape_cast %16 : vector<1x1x128xf32> to vector<1x128xf32>
    %cst_7 = arith.constant 1.000000e+00 : f32
    %18 = vector.broadcast %cst_7 : f32 to vector<1x128xf32>
    %19 = arith.addf %17, %18 : vector<1x128xf32>
    %cst_8 = arith.constant 5.000000e-01 : f32
    %20 = vector.broadcast %cst_8 : f32 to vector<1x128xf32>
    %21 = arith.mulf %19, %20 : vector<1x128xf32>
    %cst_9 = arith.constant 1.500000e+01 : f32
    %22 = vector.broadcast %cst_9 : f32 to vector<1x128xf32>
    %23 = arith.mulf %21, %22 : vector<1x128xf32>
    %24 = tpu.iota {dimensions = array<i32: 0>} : vector<16x128xi32>
    %25 = vector.broadcast %15 : i32 to vector<16x128xi32>
    %26 = arith.addi %25, %24 : vector<16x128xi32>
    %27 = arith.sitofp %26 : vector<16x128xi32> to vector<16x128xf32>
    %28 = vector.broadcast %23 : vector<1x128xf32> to vector<16x128xf32>
    %29 = arith.subf %28, %27 : vector<16x128xf32>
    %30 = math.absf %29 : vector<16x128xf32>
    %cst_10 = arith.constant 1.000000e+00 : f32
    %31 = vector.broadcast %cst_10 : f32 to vector<16x128xf32>
    %32 = arith.subf %31, %30 : vector<16x128xf32>
    %cst_11 = arith.constant 0.000000e+00 : f32
    %33 = vector.broadcast %cst_11 : f32 to vector<16x128xf32>
    %34 = arith.maximumf %32, %33 : vector<16x128xf32>
    %c0_12 = arith.constant 0 : index
    %c1 = arith.constant 1 : index
    %c0_13 = arith.constant 0 : index
    %35 = vector.load %arg4[%c0_12, %c1, %c0_13] : memref<1x3x128xf32, #tpu.memory_space<vmem>>, vector<1x1x128xf32>
    %36 = vector.shape_cast %35 : vector<1x1x128xf32> to vector<1x128xf32>
    %cst_14 = arith.constant 1.000000e+00 : f32
    %37 = vector.broadcast %cst_14 : f32 to vector<1x128xf32>
    %38 = arith.addf %36, %37 : vector<1x128xf32>
    %cst_15 = arith.constant 5.000000e-01 : f32
    %39 = vector.broadcast %cst_15 : f32 to vector<1x128xf32>
    %40 = arith.mulf %38, %39 : vector<1x128xf32>
    %cst_16 = arith.constant 1.500000e+01 : f32
    %41 = vector.broadcast %cst_16 : f32 to vector<1x128xf32>
    %42 = arith.mulf %40, %41 : vector<1x128xf32>
    %43 = tpu.iota {dimensions = array<i32: 0>} : vector<16x128xi32>
    %c0_i32_17 = arith.constant 0 : i32
    %44 = vector.broadcast %c0_i32_17 : i32 to vector<16x128xi32>
    %45 = arith.addi %44, %43 : vector<16x128xi32>
    %46 = arith.sitofp %45 : vector<16x128xi32> to vector<16x128xf32>
    %47 = vector.broadcast %42 : vector<1x128xf32> to vector<16x128xf32>
    %48 = arith.subf %47, %46 : vector<16x128xf32>
    %49 = math.absf %48 : vector<16x128xf32>
    %cst_18 = arith.constant 1.000000e+00 : f32
    %50 = vector.broadcast %cst_18 : f32 to vector<16x128xf32>
    %51 = arith.subf %50, %49 : vector<16x128xf32>
    %cst_19 = arith.constant 0.000000e+00 : f32
    %52 = vector.broadcast %cst_19 : f32 to vector<16x128xf32>
    %53 = arith.maximumf %51, %52 : vector<16x128xf32>
    %54 = arith.truncf %53 : vector<16x128xf32> to vector<16x128xbf16>
    %c0_20 = arith.constant 0 : index
    %c2 = arith.constant 2 : index
    %c0_21 = arith.constant 0 : index
    %55 = vector.load %arg4[%c0_20, %c2, %c0_21] : memref<1x3x128xf32, #tpu.memory_space<vmem>>, vector<1x1x128xf32>
    %56 = vector.shape_cast %55 : vector<1x1x128xf32> to vector<1x128xf32>
    %cst_22 = arith.constant 1.000000e+00 : f32
    %57 = vector.broadcast %cst_22 : f32 to vector<1x128xf32>
    %58 = arith.addf %56, %57 : vector<1x128xf32>
    %cst_23 = arith.constant 5.000000e-01 : f32
    %59 = vector.broadcast %cst_23 : f32 to vector<1x128xf32>
    %60 = arith.mulf %58, %59 : vector<1x128xf32>
    %cst_24 = arith.constant 1.500000e+01 : f32
    %61 = vector.broadcast %cst_24 : f32 to vector<1x128xf32>
    %62 = arith.mulf %60, %61 : vector<1x128xf32>
    %63 = tpu.iota {dimensions = array<i32: 0>} : vector<16x128xi32>
    %c0_i32_25 = arith.constant 0 : i32
    %64 = vector.broadcast %c0_i32_25 : i32 to vector<16x128xi32>
    %65 = arith.addi %64, %63 : vector<16x128xi32>
    %66 = arith.sitofp %65 : vector<16x128xi32> to vector<16x128xf32>
    %67 = vector.broadcast %62 : vector<1x128xf32> to vector<16x128xf32>
    %68 = arith.subf %67, %66 : vector<16x128xf32>
    %69 = math.absf %68 : vector<16x128xf32>
    %cst_26 = arith.constant 1.000000e+00 : f32
    %70 = vector.broadcast %cst_26 : f32 to vector<16x128xf32>
    %71 = arith.subf %70, %69 : vector<16x128xf32>
    %cst_27 = arith.constant 0.000000e+00 : f32
    %72 = vector.broadcast %cst_27 : f32 to vector<16x128xf32>
    %73 = arith.maximumf %71, %72 : vector<16x128xf32>
    %74 = arith.truncf %73 : vector<16x128xf32> to vector<16x128xbf16>
    %75 = vector.shape_cast %54 : vector<16x128xbf16> to vector<16x1x128xbf16>
    %76 = vector.shape_cast %74 : vector<16x128xbf16> to vector<1x16x128xbf16>
    %77 = vector.broadcast %75 : vector<16x1x128xbf16> to vector<16x16x128xbf16>
    %78 = vector.broadcast %76 : vector<1x16x128xbf16> to vector<16x16x128xbf16>
    %79 = arith.mulf %77, %78 : vector<16x16x128xbf16>
    %80 = vector.shape_cast %79 : vector<16x16x128xbf16> to vector<256x128xbf16>
    %81 = vector.shape_cast %14 : vector<3x128xf32> to vector<3x1x128xf32>
    %82 = vector.shape_cast %34 : vector<16x128xf32> to vector<1x16x128xf32>
    %83 = vector.broadcast %81 : vector<3x1x128xf32> to vector<3x16x128xf32>
    %84 = vector.broadcast %82 : vector<1x16x128xf32> to vector<3x16x128xf32>
    %85 = arith.mulf %83, %84 : vector<3x16x128xf32>
    %86 = vector.shape_cast %85 : vector<3x16x128xf32> to vector<48x128xf32>
    %87 = arith.truncf %86 : vector<48x128xf32> to vector<48x128xbf16>
    %cst_28 = arith.constant dense<0.000000e+00> : vector<48x256xf32>
    %88 = tpu.matmul %87, %80, %cst_28 {dimension_numbers = #tpu.dot_dimension_numbers<[1], [1], [0], [0], [0, 0, 1, 0], [], []>} : vector<48x128xbf16>, vector<256x128xbf16>, vector<48x256xf32> -> vector<48x256xf32>
    %c0_29 = arith.constant 0 : index
    %c0_30 = arith.constant 0 : index
    %c0_31 = arith.constant 0 : index
    %c0_32 = arith.constant 0 : index
    %89 = vector.load %arg5[%c0_29, %c0_30, %c0_31, %c0_32] : memref<1x3x16x256xf32, #tpu.memory_space<vmem>>, vector<1x3x16x256xf32>
    %90 = vector.shape_cast %88 : vector<48x256xf32> to vector<1x3x16x256xf32>
    %91 = arith.addf %89, %90 : vector<1x3x16x256xf32>
    %c0_33 = arith.constant 0 : index
    %c0_34 = arith.constant 0 : index
    %c0_35 = arith.constant 0 : index
    %c0_36 = arith.constant 0 : index
    %92 = vector.load %arg5[%c0_33, %c0_34, %c0_35, %c0_36] : memref<1x3x16x256xf32, #tpu.memory_space<vmem>>, vector<1x3x16x256xf32>
    tpu.vector_store %arg5[%c0_33, %c0_34, %c0_35, %c0_36], %91 {strides = array<i32>} : memref<1x3x16x256xf32, #tpu.memory_space<vmem>>, vector<1x3x16x256xf32>,
    return
  }
  func.func @transform_0(%arg0: i32, %arg1: i32, %arg2: i32) -> (i32, i32, i32) {
    %c0_i32 = arith.constant 0 : i32
    %c0_i32_0 = arith.constant 0 : i32
    return %arg0, %c0_i32, %arg2 : i32, i32, i32
  }
  func.func @transform_1(%arg0: i32, %arg1: i32, %arg2: i32) -> (i32, i32, i32) {
    %c0_i32 = arith.constant 0 : i32
    %c0_i32_0 = arith.constant 0 : i32
    return %arg0, %c0_i32, %arg2 : i32, i32, i32
  }
  func.func @transform_2(%arg0: i32, %arg1: i32, %arg2: i32) -> (i32, i32, i32, i32) {
    %c0_i32 = arith.constant 0 : i32
    %c0_i32_0 = arith.constant 0 : i32
    %c0_i32_1 = arith.constant 0 : i32
    return %arg0, %c0_i32, %arg1, %c0_i32_0 : i32, i32, i32, i32
  }
}

</mosaic_0001>

<bundles_post_ra>
// kernel: tpu_custom_call.1
= control target key start
LH: loop header
LB: loop body
LE: loop exit
PB: predicated region body
PF: predicated region fallthrough
CT: control target
= control target key end

     0   :  { %7 = vsyncpa [#allocation3], 0  ;;  %s1262_s0 = inlined_call_operand.vmem [shape: f32[2,4,128], index: 0, kind: input, shape index: {}]   ;;  %s1263_s1 = inlined_call_operand.vmem [shape: f32[2,3,128], index: 1, kind: input, shape index: {}]   ;;  %s1264_s2 = inlined_call_operand.hbm [shape: f32[2,3,16,256], index: 2, kind: output, shape index: {}]  }
   0x1   :  { %9 = vsyncpa [#allocation3 + $0x1], 0  ;;  %s1043_s9 = smov 0   ;;  %s1045_s10 = smov 0  }
   0x2   :  { %s1047_s11 = smov 0   ;;  %s1049_s12 = smov 0  }
   0x3   :  { %s1051_s13 = smov 0   ;;  %s1053_s14 = smov 0  }
   0x4 LB: > { %s848_s15 = sadd.s32 4294967295, %s1024_s14   ;;  %s849_s16 = sadd.s32 4294967294, %s1024_s14   ;;  %s1024_s14 = sphi %s1053_s14, %s15_s14   ;;  %s1020_s13 = sphi %s1051_s13, %s1273_s13   ;;  %s1016_s12 = sphi %s1049_s12, %s1272_s12   ;;  %s1012_s11 = sphi %s1047_s11, %s1271_s11   ;;  %s1008_s10 = sphi %s1045_s10, %s1270_s10   ;;  %s1004_s9 = sphi %s1043_s9, %s1269_s9  }
   0x5   : > { %s34_s17 = sadd.s32 1, %s1020_s13  ;;  %s99_s18 = sadd.s32 1, %s1012_s11 }
   0x6   : > { %p36_p0 = scmp.ge.s32.totalorder %s34_s17, 2  ;;  %p109_p1 = scmp.ne.s32.totalorder %s1012_s11, %s1008_s10 }
   0x7   : > { %p110_p2 = scmp.eq.s32.totalorder %s848_s15, 1  ;;  %p115_p3 = scmp.ne.s32.totalorder %s1008_s10, %s1004_s9 }
   0x8   : > { %s1275_s17 = smov (%p36_p0, %s34_s17), 0  ;;  %p116_p5 = scmp.eq.s32.totalorder %s849_s16, 1 }
   0x9   : > { %p1083_p4 = por %p110_p2, %p109_p1  ;;  %s94_s20 = ssub.s32 %s1020_s13, %s1275_s17 }
   0xa   : > { %p852_p6 = scmp.ge.s32.totalorder %s1024_s14, 1  ;;  %p97_p7 = scmp.eq.s32.totalorder %s94_s20, 0 }
   0xb   : > { %p1090_p8 = por %p116_p5, %p115_p3  ;;  %p154_p9 = scmp.lt.s32.totalorder %s1024_s14, 3 }
   0xc   : > { %s1096_s22 = scalar_select %p97_p7, %s1012_s11, %s99_s18  }
   0xd   : > { %p155_p10 = pnand %p852_p6, %p154_p9 }
   0xe   : > { %p185_p11 = scmp.lt.s32.totalorder (!%p155_p10), %s1016_s12, 1  ;;  %s182_s3 = sand.u32 (!%p155_p10), 1, %s1008_s10  }
   0xf   : > { %158 = sbr.rel (%p155_p10) target bundleno = 293 (0x125), region = 28  ;;  %s736_s20 = scalar_lea.sflag (!%p155_p10), [#allocation3], %s182_s3 }
  0x10   : > { %s882_s4 = smul.u32 (!%p155_p10), 96, %s182_s3  ;;  %s966_s26 = scalar_lea.hbm (!%p155_p10), %s1264_s2, 192 }
  0x11   : > { %s883_s6 = smul.u32 (!%p155_p10), 96, %s1016_s12 }
  0x12   : > { %s184_s5 = scalar_lea.vmem (!%p155_p10), [#allocation2], %s882_s4 }
  0x13   : > { %s750_s15 = scalar_lea.hbm (!%p155_p10), %s1264_s2, %s883_s6  ;;  %s751_s16 = sshll.u32 (!%p155_p10), %s184_s5, 4  ;;  %s752_s16 = int_to_ptr.vmem [resolvable:$true] %s751_s16 }
  0x14   : > { %v255_v0 = vlaneseq  ;;  %s186_s23 = scalar_select %p185_p11, %s1016_s12, 1  ;;  %vm217_vm0 = vcmask 1043456   ;;  %vm321_vm1 = vcmask 1043459   ;;  %vm317_vm2 = vcmask 1042434  }
  0x15   : > { %vm313_vm3 = vcmask 1041409   ;;  %vm308_vm4 = vcmask 1040384   ;;  %s753_s18 = sshll.u32 %s750_s15, 4  ;;  %s754_s18 = int_to_ptr.hbm [resolvable:$true] %s753_s18 }
  0x16   : > { %v256_v1 = vshrl.u32 %v255_v0, 7  ;;  %s853_s24 = sshll.u32 %s186_s23, 2  ;;  %s960_s12 = sshra.s32 %s754_s18, 4  ;;  %s961_s12 = int_to_ptr.hbm [resolvable:$true] %s960_s12 }
  0x17   : > { %s191_s27 = scalar_lea.vmem %s1262_s0, %s853_s24  ;;  %s1106_s30 = scalar_lea.vmem %s1263_s1, %s853_s24 }
  0x18   : > { %v216_v2 = vld [vmem:[%s191_s27] sm:$0xf]  ;;  %v257_v6 = vadd.s32 8, %v256_v1  ;;  %v1111_v13 = vcvt.s32.f32 %v256_v1  ;;  %s962_s23 = scalar_lea.hbm %s961_s12, 96  ;;  %p967_p1 = scmp.lt.s32.totalorder %s961_s12, %s1264_s2 }
  0x19   : > { %v272_v3 = vld [vmem:[%s1106_s30 + $0x1] sm:$0x1]  ;;  %v289_v4 = vld [vmem:[%s1106_s30 + $0x2] sm:$0x1]  ;;  %v218_v5 = vsel %vm217_vm0, %v216_v2, -inf  ;;  %p963_p12 = scmp.ne.s32.totalorder %s961_s12, %s962_s23  ;;  %p968_p2 = scmp.lt.s32.totalorder %s966_s26, %s962_s23 }
  0x1a   : > { %v273_v7 = vadd.f32 1.0, %v272_v3  ;;  %v290_v8 = vadd.f32 1.0, %v289_v4  ;;  %v219_v9 = vrot.slane %v218_v5, 4  ;;  %v1113_v14 = vcvt.s32.f32 %v257_v6 }
  0x1b   : > { %p964_p13 = pnand %p963_p12, %p1083_p4  ;;  %p969_p3 = por %p968_p2, %p967_p1 }
  0x1c   : > { %v274_v10 = vmul.f32 0.5, %v273_v7  ;;  %v291_v11 = vmul.f32 0.5, %v290_v8  ;;  %v220_v12 = vmax.f32 %v218_v5, %v219_v9 }
  0x1d   : > { %p965_p0 = pneg %p964_p13 }
  0x1e   : > { %v275_v15 = vmul.f32 15.0, %v274_v10  ;;  %v292_v16 = vmul.f32 15.0, %v291_v11  ;;  %v221_v17 = vrot.slane %v220_v12, 2 }
  0x1f   : > { %p970_p5 = pnand %p969_p3, %p965_p0 }
  0x20   : > { %v278_v18 = vperm.slane %v275_v15, 0  ;;  %v293_v19 = vperm.slane %v292_v16, 0  ;;  %v222_v20 = vmax.f32 %v220_v12, %v221_v17 }
  0x22   : > { %v279_v21 = vsub.f32 %v278_v18, %v1111_v13  ;;  %v294_v22 = vsub.f32 %v293_v19, %v1111_v13  ;;  %v280_v23 = vsub.f32 %v278_v18, %v1113_v14  ;;  %v223_v24 = vrot.slane %v222_v20, 1 }
  0x23   : > { %v295_v26 = vsub.f32 %v293_v19, %v1113_v14 }
  0x24   : > { %v281_v25 = vand.u32 2147483647, %v279_v21  ;;  %v296_v27 = vand.u32 2147483647, %v294_v22  ;;  %v224_v28 = vmax.f32 %v222_v20, %v223_v24  ;;  %v282_v29 = vand.u32 2147483647, %v280_v23 }
  0x25   : > { %v297_v34 = vand.u32 2147483647, %v295_v26 }
  0x26   : > { %v283_v30 = vsub.f32 1.0, %v281_v25  ;;  %v225_v31 = vsub.f32 %v216_v2, %v224_v28  ;;  %v284_v32 = vsub.f32 1.0, %v282_v29  ;;  %v298_v35 = vsub.f32 1.0, %v296_v27 }
  0x27   : > { %v299_v40 = vsub.f32 1.0, %v297_v34 }
  0x28   : > { %v285_v33 = vmax.f32 %v283_v30, 0.0  ;;  %v226_v36 = vmul.f32 1.442695, %v225_v31  ;;  %v286_v37 = vmax.f32 %v284_v32, 0.0  ;;  %v300_v41 = vmax.f32 %v298_v35, 0.0 }
  0x29   : > { %v301_v50 = vmax.f32 %v299_v40, 0.0 }
  0x2a   : > { %v1119_v38 = vpack.c.bf16 %v285_v33, %v285_v33  ;;  %942 = vpow2.f32 %v226_v36  ;;  %v1121_v39 = vpack.c.bf16 %v286_v37, %v286_v37  ;;  %v302_v51 = vpack.c.bf16 %v300_v41, %v300_v41 }
  0x2b   : > { %v303_v3 = vpack.c.bf16 %v301_v50, %v301_v50 }
  0x2c   : > { %v1124_v42 = vrot.slane %v1119_v38, 3  ;;  %v1127_v43 = vrot.slane %v1121_v39, 3  ;;  %v1144_v20 = vunpack.c.l.bf16 %v302_v51 }
  0x2d   : > { %v1146_v21 = vunpack.c.l.bf16 %v303_v3 }
  0x2e   : > { %v322_v44 = vsel %vm321_vm1, %v1119_v38, %v1124_v42  ;;  %v318_v45 = vsel %vm317_vm2, %v1119_v38, %v1124_v42  ;;  %v335_v47 = vsel %vm321_vm1, %v1121_v39, %v1127_v43  ;;  %v332_v49 = vsel %vm317_vm2, %v1121_v39, %v1127_v43 }
  0x2f   : > { %v324_v46 = vrot.slane %v322_v44, 3  ;;  %v320_v48 = vrot.slane %v318_v45, 2  ;;  %v337_v52 = vrot.slane %v335_v47, 3  ;;  %v1137_v53 = vrot.slane %v332_v49, 2 }
  0x30   : > { %v1139_v54 = vpop.eup %942  ;;  %v314_v31 = vsel %vm313_vm3, %v1119_v38, %v1124_v42  ;;  %v329_v41 = vsel %vm313_vm3, %v1121_v39, %v1127_v43 }
  0x31   : > { %v345_v55 = vunpack.i.h.s16 %v324_v46  ;;  %v858_v56 = vpack.i.b16 %v324_v46, %v324_v46  ;;  %v343_v57 = vunpack.i.h.s16 %v320_v48  ;;  %v857_v58 = vpack.i.b16 %v320_v48, %v320_v48 }
  0x32   : > { %v228_v59 = vsel %vm217_vm0, %v1139_v54, 0.0  ;;  %v353_v60 = vunpack.i.h.s16 %v337_v52  ;;  %v862_v61 = vpack.i.b16 %v337_v52, %v337_v52  ;;  %v351_v62 = vunpack.i.h.s16 %v1137_v53 }
  0x33   : > { %v229_v63 = vrot.slane %v228_v59, 4  ;;  %v361_v0 = vpack.i.b16 %v345_v55, %v345_v55  ;;  %v376_v1 = vperm.slane %v858_v56, 0  ;;  %v359_v2 = vpack.i.b16 %v343_v57, %v343_v57 }
  0x34   : > { %v369_v4 = vpack.i.b16 %v353_v60, %v353_v60  ;;  %v384_v5 = vperm.slane %v862_v61, 0  ;;  %v367_v6 = vpack.i.b16 %v351_v62, %v351_v62  ;;  %v374_v10 = vperm.slane %v857_v58, 0 }
  0x35   : > { %v377_v7 = vperm.slane %v361_v0, 0  ;;  %v411_v8 = vpack.i.b16 %v376_v1, %v376_v1  ;;  %v375_v9 = vperm.slane %v359_v2, 0  ;;  %v230_v11 = vadd.f32 %v229_v63, %v228_v59 }
  0x36   : > { %v385_v12 = vperm.slane %v369_v4, 0  ;;  %v443_v15 = vpack.i.b16 %v384_v5, %v384_v5  ;;  %v383_v19 = vperm.slane %v367_v6, 0  ;;  %v403_v27 = vpack.i.b16 %v374_v10, %v374_v10 }
  0x37   : > { %v415_v16 = vpack.i.b16 %v377_v7, %v377_v7  ;;  %v413_v17 = vperm.slane %v411_v8, 0  ;;  %v407_v18 = vpack.i.b16 %v375_v9, %v375_v9  ;;  %v231_v28 = vrot.slane %v230_v11, 2 }
  0x38   : > { %v447_v22 = vpack.i.b16 %v385_v12, %v385_v12  ;;  %v445_v23 = vperm.slane %v443_v15, 0  ;;  %v439_v35 = vpack.i.b16 %v383_v19, %v383_v19  ;;  %v405_v47 = vperm.slane %v403_v27, 0 }
  0x39   : > { %v417_v24 = vperm.slane %v415_v16, 0  ;;  %v456_v25 = vunpack.c.l.bf16 %v413_v17  ;;  %v409_v26 = vperm.slane %v407_v18, 0  ;;  %v232_v48 = vadd.f32 %v231_v28, %v230_v11 }
  0x3a   : > { %v449_v29 = vperm.slane %v447_v22, 0  ;;  %v464_v30 = vunpack.c.l.bf16 %v445_v23  ;;  %v441_v57 = vperm.slane %v439_v35, 0  ;;  %v454_v1 = vunpack.c.l.bf16 %v405_v47 }
  0x3b   : > { %v457_v32 = vunpack.c.l.bf16 %v417_v24  ;;  %v480_v33 = vmul.f32 %v1144_v20, %v456_v25  ;;  %v481_v34 = vmul.f32 %v1146_v21, %v456_v25  ;;  %v455_v46 = vunpack.c.l.bf16 %v409_v26 }
  0x3c   : > { %v465_v36 = vunpack.c.l.bf16 %v449_v29  ;;  %v496_v37 = vmul.f32 %v1144_v20, %v464_v30  ;;  %v497_v40 = vmul.f32 %v1146_v21, %v464_v30  ;;  %v233_v2 = vrot.slane %v232_v48, 1 }
  0x3d   : > { %v482_v44 = vmul.f32 %v1144_v20, %v457_v32  ;;  %v483_v45 = vmul.f32 %v1146_v21, %v457_v32  ;;  %v512_v51 = vpack.c.bf16 %v480_v33, %v480_v33  ;;  %v513_v56 = vpack.c.bf16 %v481_v34, %v481_v34 }
  0x3e   : > { %v498_v49 = vmul.f32 %v1144_v20, %v465_v36  ;;  %v499_v50 = vmul.f32 %v1146_v21, %v465_v36  ;;  %v528_v60 = vpack.c.bf16 %v496_v37, %v496_v37  ;;  %v529_v61 = vpack.c.bf16 %v497_v40, %v497_v40 }
  0x3f   : > { %v514_v52 = vpack.c.bf16 %v482_v44, %v482_v44  ;;  %v515_v55 = vpack.c.bf16 %v483_v45, %v483_v45  ;;  %v478_v0 = vmul.f32 %v1144_v20, %v455_v46  ;;  %v599_v5 = vunpack.c.l.b16 %v512_v51 }
  0x40   : > { %v530_v58 = vpack.c.bf16 %v498_v49, %v498_v49  ;;  %v531_v59 = vpack.c.bf16 %v499_v50, %v499_v50  ;;  %v600_v7 = vunpack.c.l.b16 %v513_v56  ;;  %v479_v8 = vmul.f32 %v1146_v21, %v455_v46 }
  0x41   : > { %v601_v62 = vunpack.c.l.b16 %v514_v52  ;;  %v602_v63 = vunpack.c.l.b16 %v515_v55  ;;  %v463_v9 = vunpack.c.l.bf16 %v441_v57  ;;  %v615_v11 = vunpack.c.l.b16 %v528_v60 }
  0x42   : > { %v617_v3 = vunpack.c.l.b16 %v530_v58  ;;  %v618_v4 = vunpack.c.l.b16 %v531_v59  ;;  %v616_v12 = vunpack.c.l.b16 %v529_v61  ;;  %v510_v15 = vpack.c.bf16 %v478_v0, %v478_v0 }
  0x43   : > { %v626_v6 = vpack.c.b16 %v602_v63, %v601_v62  ;;  %v511_v16 = vpack.c.bf16 %v479_v8, %v479_v8  ;;  %v494_v17 = vmul.f32 %v1144_v20, %v463_v9  ;;  %v495_v18 = vmul.f32 %v1146_v21, %v463_v9 }
  0x44   : > { %v634_v10 = vpack.c.b16 %v618_v4, %v617_v3  ;;  %v1166_v19 = vadd.f32 %v233_v2, %v232_v48  ;;  %v861_v22 = vpack.i.b16 %v1137_v53, %v1137_v53  ;;  %v316_v23 = vrot.slane %v314_v31, 1 }
  0x45   : > { %866 = vmatpush.bf16.xpose.msra.mxu2 %v626_v6  ;;  %651 = vmatpush.bf16.xpose.msra.mxu0 %v626_v6  ;;  %v625_v24 = vpack.c.b16 %v600_v7, %v599_v5  ;;  %v526_v25 = vpack.c.bf16 %v494_v17, %v494_v17  ;;  %v527_v26 = vpack.c.bf16 %v495_v18, %v495_v18  ;;  %v331_v27 = vrot.slane %v329_v41, 1 }
  0x46   : > { %874 = vmatpush.bf16.xpose.msra.mxu3 %v634_v10  ;;  %675 = vmatpush.bf16.xpose.msra.mxu1 %v634_v10  ;;  %v633_v28 = vpack.c.b16 %v616_v12, %v615_v11  ;;  %v476_v29 = vmul.f32 %v1144_v20, %v454_v1  ;;  %v382_v30 = vperm.slane %v861_v22, 0  ;;  %v341_v32 = vunpack.i.h.s16 %v316_v23 }
  0x47   : > { %v597_v33 = vunpack.c.l.b16 %v510_v15  ;;  %v598_v34 = vunpack.c.l.b16 %v511_v16  ;;  %v477_v35 = vmul.f32 %v1146_v21, %v454_v1  ;;  %v349_v36 = vunpack.i.h.s16 %v331_v27 }
  0x48   : > { %v613_v37 = vunpack.c.l.b16 %v526_v25  ;;  %v435_v40 = vpack.i.b16 %v382_v30, %v382_v30  ;;  %v357_v44 = vpack.i.b16 %v341_v32, %v341_v32  ;;  %v856_v45 = vpack.i.b16 %v316_v23, %v316_v23 }
  0x49   : > { %v614_v53 = vunpack.c.l.b16 %v527_v26  ;;  %v365_v31 = vpack.i.b16 %v349_v36, %v349_v36  ;;  %v860_v46 = vpack.i.b16 %v331_v27, %v331_v27  ;;  %v1174_v49 = vsel %vm308_vm4, %v1119_v38, %v1124_v42 }
  0x4a   : > { %v437_v47 = vperm.slane %v435_v40, 0  ;;  %v373_v41 = vperm.slane %v357_v44, 0  ;;  %v372_v48 = vperm.slane %v856_v45, 0  ;;  %v339_v52 = vunpack.i.h.s16 %v1174_v49 }
  0x4b   : > { %v381_v50 = vperm.slane %v365_v31, 0  ;;  %v380_v51 = vperm.slane %v860_v46, 0  ;;  %v1179_v55 = vsel %vm308_vm4, %v1121_v39, %v1127_v43  ;;  %v508_v56 = vpack.c.bf16 %v476_v29, %v476_v29 }
  0x4c   : > { %v462_v57 = vunpack.c.l.bf16 %v437_v47  ;;  %v399_v58 = vpack.i.b16 %v373_v41, %v373_v41  ;;  %v395_v59 = vpack.i.b16 %v372_v48, %v372_v48  ;;  %v355_v38 = vpack.i.b16 %v339_v52, %v339_v52 }
  0x4d   : > { %867 = vmatpush.bf16.xpose.msra.mxu2 %v625_v24  ;;  %652 = vmatpush.bf16.xpose.msra.mxu0 %v625_v24  ;;  %v431_v60 = vpack.i.b16 %v381_v50, %v381_v50  ;;  %v427_v61 = vpack.i.b16 %v380_v51, %v380_v51  ;;  %v347_v42 = vunpack.i.h.s16 %v1179_v55  ;;  %v624_v2 = vpack.c.b16 %v598_v34, %v597_v33 }
  0x4e   : > { %875 = vmatpush.bf16.xpose.msra.mxu3 %v633_v28  ;;  %676 = vmatpush.bf16.xpose.msra.mxu1 %v633_v28  ;;  %v492_v62 = vmul.f32 %v1144_v20, %v462_v57  ;;  %v493_v63 = vmul.f32 %v1146_v21, %v462_v57  ;;  %v401_v0 = vperm.slane %v399_v58, 0  ;;  %v397_v1 = vperm.slane %v395_v59, 0 }
  0x4f   : > { %v632_v39 = vpack.c.b16 %v614_v53, %v613_v37  ;;  %v509_v43 = vpack.c.bf16 %v477_v35, %v477_v35  ;;  %v433_v3 = vperm.slane %v431_v60, 0  ;;  %v429_v7 = vperm.slane %v427_v61, 0 }
  0x50   : > { %v524_v4 = vpack.c.bf16 %v492_v62, %v492_v62  ;;  %v525_v5 = vpack.c.bf16 %v493_v63, %v493_v63  ;;  %v453_v6 = vunpack.c.l.bf16 %v401_v0  ;;  %v371_v9 = vperm.slane %v355_v38, 0 }
  0x51   : > { %v461_v8 = vunpack.c.l.bf16 %v433_v3  ;;  %v363_v10 = vpack.i.b16 %v347_v42, %v347_v42  ;;  %v452_v15 = vunpack.c.l.bf16 %v397_v1  ;;  %v595_v16 = vunpack.c.l.b16 %v508_v56 }
  0x52   : > { %v474_v11 = vmul.f32 %v1144_v20, %v453_v6  ;;  %v475_v12 = vmul.f32 %v1146_v21, %v453_v6  ;;  %v596_v17 = vunpack.c.l.b16 %v509_v43  ;;  %944 = vrcp.f32 %v1166_v19 }
  0x53   : > { %v490_v18 = vmul.f32 %v1144_v20, %v461_v8  ;;  %v491_v22 = vmul.f32 %v1146_v21, %v461_v8  ;;  %v611_v23 = vunpack.c.l.b16 %v524_v4  ;;  %v612_v24 = vunpack.c.l.b16 %v525_v5 }
  0x54   : > { %v460_v25 = vunpack.c.l.bf16 %v429_v7  ;;  %v391_v26 = vpack.i.b16 %v371_v9, %v371_v9  ;;  %v379_v27 = vperm.slane %v363_v10, 0  ;;  %v506_v28 = vpack.c.bf16 %v474_v11, %v474_v11 }
  0x55   : > { %868 = vmatpush.bf16.xpose.msra.mxu2 %v624_v2  ;;  %653 = vmatpush.bf16.xpose.msra.mxu0 %v624_v2  ;;  %v507_v29 = vpack.c.bf16 %v475_v12, %v475_v12  ;;  %v472_v30 = vmul.f32 %v1144_v20, %v452_v15  ;;  %v855_v32 = vpack.i.b16 %v1174_v49, %v1174_v49  ;;  %v244_v1 = vand.u32 2147483647, %v1166_v19  ;;  %v251_v2 = vld [vmem:[%s1106_s30] sm:$0x1] }
  0x56   : > { %876 = vmatpush.bf16.xpose.msra.mxu3 %v632_v39  ;;  %677 = vmatpush.bf16.xpose.msra.mxu1 %v632_v39  ;;  %v623_v33 = vpack.c.b16 %v596_v17, %v595_v16  ;;  %v522_v34 = vpack.c.bf16 %v490_v18, %v490_v18  ;;  %v523_v35 = vpack.c.bf16 %v491_v22, %v491_v22  ;;  %v393_v45 = vperm.slane %v391_v26, 0 }
  0x57   : > { %v631_v36 = vpack.c.b16 %v612_v24, %v611_v23  ;;  %v473_v37 = vmul.f32 %v1146_v21, %v452_v15  ;;  %v488_v40 = vmul.f32 %v1144_v20, %v460_v25  ;;  %v489_v44 = vmul.f32 %v1146_v21, %v460_v25 }
  0x58   : > { %v423_v53 = vpack.i.b16 %v379_v27, %v379_v27  ;;  %v945_v31 = vpop.eup %944  ;;  %v593_v46 = vunpack.c.l.b16 %v506_v28  ;;  %v594_v47 = vunpack.c.l.b16 %v507_v29  ;;  %v504_v41 = vpack.c.bf16 %v472_v30, %v472_v30 }
  0x59   : > { %v370_v48 = vperm.slane %v855_v32, 0  ;;  %v609_v50 = vunpack.c.l.b16 %v522_v34  ;;  %v610_v49 = vunpack.c.l.b16 %v523_v35  ;;  %v859_v52 = vpack.i.b16 %v1179_v55, %v1179_v55 }
  0x5a   : > { %v425_v51 = vperm.slane %v423_v53, 0  ;;  %v505_v56 = vpack.c.bf16 %v473_v37, %v473_v37  ;;  %v520_v57 = vpack.c.bf16 %v488_v40, %v488_v40  ;;  %v521_v58 = vpack.c.bf16 %v489_v44, %v489_v44 }
  0x5b   : > { %v451_v59 = vunpack.c.l.bf16 %v393_v45  ;;  %v378_v60 = vperm.slane %v859_v52, 0  ;;  %v236_v61 = vmul.f32 %v945_v31, %v1166_v19  ;;  %v622_v38 = vpack.c.b16 %v594_v47, %v593_v46 }
  0x5c   : > { %v591_v42 = vunpack.c.l.b16 %v504_v41  ;;  %v630_v62 = vpack.c.b16 %v610_v49, %v609_v50  ;;  %v459_v63 = vunpack.c.l.bf16 %v425_v51  ;;  %v387_v0 = vpack.i.b16 %v370_v48, %v370_v48 }
  0x5d   : > { %869 = vmatpush.bf16.xpose.msra.mxu2 %v623_v33  ;;  %654 = vmatpush.bf16.xpose.msra.mxu0 %v623_v33  ;;  %v419_v39 = vpack.i.b16 %v378_v60, %v378_v60  ;;  %v237_v43 = vsub.f32 1.0, %v236_v61  ;;  %vm240_vm5 = vweird.f32 %v1166_v19  ;;  %vm241_vm6 = vweird.f32 %v945_v31 }
  0x5e   : > { %877 = vmatpush.bf16.xpose.msra.mxu3 %v631_v36  ;;  %678 = vmatpush.bf16.xpose.msra.mxu1 %v631_v36  ;;  %v592_v55 = vunpack.c.l.b16 %v505_v56  ;;  %v607_v3 = vunpack.c.l.b16 %v520_v57  ;;  %v608_v4 = vunpack.c.l.b16 %v521_v58  ;;  %v470_v5 = vmul.f32 %v1144_v20, %v451_v59  ;;  %vm1208_vm7 = vmor %vm240_vm5, %vm241_vm6 }
  0x5f   : > { %v471_v6 = vmul.f32 %v1146_v21, %v451_v59  ;;  %v238_v7 = vmul.f32 %v945_v31, %v237_v43  ;;  %v246_v8 = vand.u32 2147483648, %v1166_v19  ;;  %v252_v9 = vadd.f32 1.0, %v251_v2 }
  0x60   : > { %v486_v10 = vmul.f32 %v1144_v20, %v459_v63  ;;  %v487_v11 = vmul.f32 %v1146_v21, %v459_v63  ;;  %v389_v12 = vperm.slane %v387_v0, 0  ;;  %vm245_vm8 = vcmp.eq.f32.partialorder %v244_v1, 8.507059e+37 }
  0x61   : > { %v421_v16 = vperm.slane %v419_v39, 0  ;;  %v239_v17 = vadd.f32 %v945_v31, %v238_v7  ;;  %v247_v18 = vor.u32 1.1754944e-38, %v246_v8  ;;  %v253_v22 = vmul.f32 0.5, %v252_v9 }
  0x62   : > { %v621_v23 = vpack.c.b16 %v592_v55, %v591_v42  ;;  %v629_v24 = vpack.c.b16 %v608_v4, %v607_v3  ;;  %v502_v25 = vpack.c.bf16 %v470_v5, %v470_v5  ;;  %v503_v28 = vpack.c.bf16 %v471_v6, %v471_v6 }
  0x63   : > { %v243_v26 = vsel %vm1208_vm7, %v945_v31, %v239_v17  ;;  %v254_v27 = vmul.f32 15.0, %v253_v22  ;;  %v518_v19 = vpack.c.bf16 %v486_v10, %v486_v10  ;;  %v450_v29 = vunpack.c.l.bf16 %v389_v12 }
  0x64   : > { %v248_v30 = vsel %vm245_vm8, %v247_v18, %v243_v26  ;;  %v519_v32 = vpack.c.bf16 %v487_v11, %v487_v11  ;;  %v458_v33 = vunpack.c.l.bf16 %v421_v16  ;;  %v589_v40 = vunpack.c.l.b16 %v502_v25 }
  0x65   : > { %870 = vmatpush.bf16.xpose.msra.mxu2 %v622_v38  ;;  %655 = vmatpush.bf16.xpose.msra.mxu0 %v622_v38  ;;  %v249_v34 = vmul.f32 %v1139_v54, %v248_v30  ;;  %v263_v35 = vperm.slane %v254_v27, 0  ;;  %v590_v44 = vunpack.c.l.b16 %v503_v28  ;;  %v468_v45 = vmul.f32 %v1144_v20, %v450_v29 }
  0x66   : > { %878 = vmatpush.bf16.xpose.msra.mxu3 %v630_v62  ;;  %679 = vmatpush.bf16.xpose.msra.mxu1 %v630_v62  ;;  %v469_v53 = vmul.f32 %v1146_v21, %v450_v29  ;;  %v605_v31 = vunpack.c.l.b16 %v518_v19  ;;  %v606_v46 = vunpack.c.l.b16 %v519_v32  ;;  %v484_v54 = vmul.f32 %v1144_v20, %v458_v33 }
  0x67   : > { %v264_v36 = vsub.f32 %v263_v35, %v1111_v13  ;;  %v265_v37 = vsub.f32 %v263_v35, %v1113_v14  ;;  %533 = vst [vmem:[#allocation1] sm:$0xff] %v249_v34  ;;  %v485_v47 = vmul.f32 %v1146_v21, %v458_v33  ;;  %v620_v14 = vpack.c.b16 %v590_v44, %v589_v40 }
  0x68   : > { %v500_v48 = vpack.c.bf16 %v468_v45, %v468_v45  ;;  %v501_v50 = vpack.c.bf16 %v469_v53, %v469_v53  ;;  %v628_v49 = vpack.c.b16 %v606_v46, %v605_v31  ;;  %v516_v51 = vpack.c.bf16 %v484_v54, %v484_v54 }
  0x69   : > { %v266_v13 = vand.u32 2147483647, %v264_v36  ;;  %v267_v41 = vand.u32 2147483647, %v265_v37  ;;  %v517_v52 = vpack.c.bf16 %v485_v47, %v485_v47 }
  0x6a   : > { %v587_v58 = vunpack.c.l.b16 %v500_v48  ;;  %v588_v59 = vunpack.c.l.b16 %v501_v50  ;;  %v603_v20 = vunpack.c.l.b16 %v516_v51 }
  0x6b   : > { %v268_v56 = vsub.f32 1.0, %v266_v13  ;;  %v269_v57 = vsub.f32 1.0, %v267_v41  ;;  %v604_v38 = vunpack.c.l.b16 %v517_v52 }
  0x6c   : > { %v619_v0 = vpack.c.b16 %v588_v59, %v587_v58 }
  0x6d   : > { %871 = vmatpush.bf16.xpose.msra.mxu2 %v621_v23  ;;  %656 = vmatpush.bf16.xpose.msra.mxu0 %v621_v23  ;;  %v270_v21 = vmax.f32 %v268_v56, 0.0  ;;  %v271_v42 = vmax.f32 %v269_v57, 0.0  ;;  %v627_v1 = vpack.c.b16 %v604_v38, %v603_v20 }
  0x6e   : > { %879 = vmatpush.bf16.xpose.msra.mxu3 %v629_v24  ;;  %680 = vmatpush.bf16.xpose.msra.mxu1 %v629_v24  ;;  %v537_v60 = vld [vmem:[#allocation1 + $0x2] ss:$9 sm:$0xff] }
  0x6f   : > { %v535_v61 = vld [vmem:[#allocation1 + $0x1] ss:$9 sm:$0xff]  ;;  %v541_v62 = vperm.slane %v537_v60, 0  ;;  %v539_v5 = vld [vmem:[#allocation1 + $0x3] ss:$9 sm:$0xff] }
  0x70   : > { %v540_v63 = vperm.slane %v535_v61, 0  ;;  %v542_v6 = vperm.slane %v539_v5, 0 }
  0x71   : > { %v548_v2 = vmul.f32 %v541_v62, %v270_v21  ;;  %v549_v39 = vmul.f32 %v541_v62, %v271_v42 }
  0x72   : > { %v546_v43 = vmul.f32 %v540_v63, %v270_v21  ;;  %v547_v55 = vmul.f32 %v540_v63, %v271_v42  ;;  %v550_v7 = vmul.f32 %v542_v6, %v270_v21  ;;  %v551_v8 = vmul.f32 %v542_v6, %v271_v42 }
  0x73   : > { %v553_v3 = vpack.c.bf16 %v549_v39, %v548_v2 }
  0x74   : > { %v552_v4 = vpack.c.bf16 %v547_v55, %v546_v43  ;;  %v554_v9 = vpack.c.bf16 %v551_v8, %v550_v7 }
  0x75   : > { %872 = vmatpush.bf16.xpose.msra.mxu2 %v620_v14  ;;  %657 = vmatpush.bf16.xpose.msra.mxu0 %v620_v14 }
  0x76   : > { %880 = vmatpush.bf16.xpose.msra.mxu3 %v628_v49  ;;  %681 = vmatpush.bf16.xpose.msra.mxu1 %v628_v49 }
  0x7d   : > { %873 = vmatpush.bf16.xpose.msra.mxu2 %v619_v0  ;;  %658 = vmatpush.bf16.xpose.msra.mxu0 %v619_v0 }
  0x7e   : > { %881 = vmatpush.bf16.xpose.msra.mxu3 %v627_v1  ;;  %682 = vmatpush.bf16.xpose.msra.mxu1 %v627_v1 }
  0x84   : > { %664 = vmatmul.bf16.vlgmr.msra.gmra.mxu2 %v553_v3  ;;  %659 = vmatmul.bf16.vlgmr.msra.gmra.mxu0 %v552_v4 }
  0x85   : > { %688 = vmatmul.bf16.vlgmr.msra.gmra.mxu3 %v553_v3  ;;  %683 = vmatmul.bf16.vlgmr.msra.gmra.mxu1 %v552_v4 }
  0x94   : > { %669 = vmatmul.bf16.gmra.mxu2 %v554_v9 }
  0x95   : > { %693 = vmatmul.bf16.gmra.mxu3 %v554_v9 }
 0x101   : > { %v660_v10 = vpop.f32.mrf.mxu0 }
 0x102   : > { %v684_v11 = vpop.f32.mrf.mxu1  ;;  %723 = vst [vmem:[%s184_s5] sm:$0xff] %v660_v10 }
 0x103   : > { %724 = vst [vmem:[%s184_s5 + $0x8] sm:$0xff] %v684_v11 }
 0x107   : > { %v665_v12 = vpop.f32.mrf.mxu2 }
 0x108   : > { %v689_v15 = vpop.f32.mrf.mxu3  ;;  %727 = vst [vmem:[%s184_s5 + $0x20] sm:$0xff] %v665_v12 }
 0x109   : > { %v662_v16 = vpop.f32.mrf.mxu0  ;;  %728 = vst [vmem:[%s184_s5 + $0x28] sm:$0xff] %v689_v15 }
 0x10a   : > { %v686_v17 = vpop.f32.mrf.mxu1  ;;  %725 = vst [vmem:[%s184_s5 + $0x10] sm:$0xff] %v662_v16 }
 0x10b   : > { %726 = vst [vmem:[%s184_s5 + $0x18] sm:$0xff] %v686_v17 }
 0x10f   : > { %v667_v18 = vpop.f32.mrf.mxu2 }
 0x110   : > { %v691_v22 = vpop.f32.mrf.mxu3  ;;  %729 = vst [vmem:[%s184_s5 + $0x30] sm:$0xff] %v667_v18 }
 0x111   : > { %730 = vst [vmem:[%s184_s5 + $0x38] sm:$0xff] %v691_v22 }
 0x117   : > { %v670_v23 = vpop.f32.mrf.mxu2 }
 0x118   : > { %v694_v24 = vpop.f32.mrf.mxu3  ;;  %731 = vst [vmem:[%s184_s5 + $0x40] sm:$0xff] %v670_v23 }
 0x119   : > { %732 = vst [vmem:[%s184_s5 + $0x48] sm:$0xff] %v694_v24 }
 0x11f   : > { %v672_v25 = vpop.f32.mrf.mxu2 }
 0x120   : > { %v696_v26 = vpop.f32.mrf.mxu3  ;;  %733 = vst [vmem:[%s184_s5 + $0x50] sm:$0xff] %v672_v25 }
 0x121   : > { %734 = vst [vmem:[%s184_s5 + $0x58] sm:$0xff] %v696_v26 }
 0x122   : > { %973 = shalt.err (!%p970_p5)
}
 0x123   : > { %s1026_s29 = smov 256   ;;  %s1027_s30 = smov 16  }
 0x124   : > { %884 = dma.vmem_to_hbm [thread:$0]  (%p1083_p4), %s752_s16, 1536, %s754_s18, %s736_s20, %s1026_s29, %s1026_s29, %s1027_s30  }
 0x125 PF: > { %p890_p6 = scmp.ge.s32.totalorder %s1024_s14, 2  ;;  %s768_s3 = sand.u32 1, %s1004_s9  }
 0x126   : > { %s769_s4 = scalar_lea.sflag [#allocation3], %s768_s3 }
 0x127   : > { %p887_p7 = pnand %p890_p6, %p1090_p8 }
 0x129   : > { %p888_p9 = pneg %p887_p7 }
 0x12b   : > { %999 = dma.done.wait (%p888_p9), %s769_s4, 1536  }
 0x12c   : > { %1001 = vsyncadd (%p888_p9), %s769_s4, 4294965760  ;;  %s15_s14 = sadd.s32 1, %s1024_s14   ;;  %s1269_s9 = smov %s1008_s10 }
 0x12d   : > { %p12_p10 = scmp.ge.s32.totalorder %s15_s14, 4   ;;  %s1270_s10 = smov %s1012_s11 }
 0x12e   : > { %s1271_s11 = smov %s1096_s22  ;;  %s1272_s12 = smov %s1020_s13 }
 0x12f   : > { %s1273_s13 = smov %s1275_s17  ;;  %14 = sbr.rel (!%p12_p10) target bundleno = 4 (0x4), region = 73 }
 0x134   :  { %775 = vsyncpa [#allocation3], 1 }
 0x135   :  { %777 = vsyncpa [#allocation3 + $0x1], 1 }

</bundles_post_ra>
